<compile_context>
chip_gen: v5e
topology: v5e:2x2
jax: 0.10.0
libtpu: 0.0.40
codegen_flags: <defaults>
</compile_context>

<pallas_src>
import functools

import jax
import jax.numpy as jnp
from jax.experimental import pallas as pl
from jax.experimental.pallas import tpu as pltpu


def _sage_layer_kernel(adj_ref, xn_ref, xs_ref, wl_ref, wr_ref, b_ref, *rest,
                       apply_post, agg_dtype):
    """One SAGEConv(aggr='sum') layer; BN already folded into (wl, wr, b).

    grid = (row tile i [parallel], adjacency column tile k [arbitrary, last]).
    Accumulates agg = A[i, :] @ x over k into an f32 VMEM scratch; on the last k
    step runs the row-local epilogue (both linear paths, LeakyReLU, L2-normalize,
    optional fused post_linear) and writes the output row tile.
    """
    if apply_post:
        w3_ref, b3_ref, o_ref, acc_ref = rest
    else:
        o_ref, acc_ref = rest

    k = pl.program_id(1)

    @pl.when(k == 0)
    def _():
        acc_ref[...] = jnp.zeros_like(acc_ref)

    # int8 adjacency tile (exact small-integer counts) widened right before the dot.
    # Layer 2 runs the dot natively in bf16 (f32 accumulation via
    # preferred_element_type); layer 1 stays f32 for raw-feature precision.
    # TODO(synk): on v7x, keep the adjacency in fp8-e4m3 (exact for counts <= 16)
    # and feed the MXU directly with no in-kernel widen.
    adj = adj_ref[...].astype(agg_dtype)
    xn = xn_ref[...]
    if xn.dtype != agg_dtype:
        xn = xn.astype(agg_dtype)
    acc_ref[...] += jnp.dot(adj, xn, preferred_element_type=jnp.float32)

    @pl.when(k == pl.num_programs(1) - 1)
    def _():
        # (A @ x) @ (W_l*s) + x @ (W_r*s) + (b_l*s + t)   [BatchNorm folded]
        xs = xs_ref[...].astype(jnp.float32)   # once per row tile; cheap
        h = (
            jnp.dot(acc_ref[...], wl_ref[...], preferred_element_type=jnp.float32)
            + jnp.dot(xs, wr_ref[...], preferred_element_type=jnp.float32)
            + b_ref[...]
        )
        # Dropout (eval) = identity; LeakyReLU(0.01)
        h = jnp.where(h > 0.0, h, 0.01 * h)
        # F.normalize(x, 2, -1) == x * rsqrt(max(||x||^2, 1e-24))  (same clamp semantics)
        n2 = jnp.sum(h * h, axis=-1, keepdims=True)
        h = h * jax.lax.rsqrt(jnp.maximum(n2, 1e-24))
        if apply_post:
            h = jnp.dot(h, w3_ref[...], preferred_element_type=jnp.float32) + b3_ref[...]
        # TODO(synk): pack 4 row-tiles of the 32-wide output into a 128-lane slab
        # (unmasked vst) once a sparse/CSR path removes the dominant N^2 stream.
        o_ref[...] = h.astype(o_ref.dtype)


def _pick_row_tile(n, cap=512):
    """Largest divisor of n that is a multiple of 32 (int8 native (32,128) tile),
    <= cap, preferring choices with n//t >= 2 so the 'parallel' row axis can split
    across both v7x TensorCores."""
    cands = [t for t in range(min(cap, n), 31, -1) if n % t == 0 and t % 32 == 0]
    for t in cands:
        if n // t >= 2:
            return t
    if cands:
        return cands[0]
    return n  # tiny / odd n: single full-extent row tile


def _pick_col_tile(n, cap=2048):
    for t in range(min(cap, n), 127, -1):
        if n % t == 0 and t % 128 == 0:
            return t
    return n  # small graphs: full extent (allowed by the (8,128) rule)


def build_adjacency(edge_index, num_nodes, dtype=jnp.int8):
    """Dense adjacency A[i, j] = #edges j -> i in a compact storage dtype.

    Build ONCE and cache across forward calls (the N^2 scatter-add rivals the
    kernel cost if rebuilt per call).  Returns (adj, max_multiplicity) so callers
    can assert the counts fit the storage dtype exactly (int8: <= 127).
    TODO(synk): for large graphs replace this O(N^2) dense path with CSR +
    PrefetchScalarGridSpec sparse aggregation so cost scales with E, not N^2.
    """
    src, dst = edge_index[0], edge_index[1]
    counts = jnp.zeros((num_nodes, num_nodes), jnp.int32).at[dst, src].add(1)
    return counts.astype(dtype), jnp.max(counts)


def _sage_layer(adj, x, wl, wr, b, w3=None, b3=None, *, tm, tk, agg_dtype,
                out_dtype, vmem_limit_bytes):
    N = adj.shape[0]
    F = x.shape[1]
    H = wl.shape[1]
    apply_post = w3 is not None

    in_arrays = [adj, x, x, wl, wr, b.reshape(1, H)]
    in_specs = [
        pl.BlockSpec((tm, tk), lambda i, k: (i, k)),   # adjacency tile (int8)
        pl.BlockSpec((tk, F), lambda i, k: (k, 0)),    # neighbour features
        pl.BlockSpec((tm, F), lambda i, k: (i, 0)),    # self features
        pl.BlockSpec((F, H), lambda i, k: (0, 0)),     # W_l (BN-folded)
        pl.BlockSpec((F, H), lambda i, k: (0, 0)),     # W_r (BN-folded)
        pl.BlockSpec((1, H), lambda i, k: (0, 0)),     # bias (BN-folded)
    ]
    if apply_post:
        in_arrays += [w3, b3.reshape(1, H)]
        in_specs += [
            pl.BlockSpec((H, H), lambda i, k: (0, 0)),
            pl.BlockSpec((1, H), lambda i, k: (0, 0)),
        ]

    kernel = functools.partial(_sage_layer_kernel, apply_post=apply_post,
                               agg_dtype=agg_dtype)
    return pl.pallas_call(
        kernel,
        out_shape=jax.ShapeDtypeStruct((N, H), out_dtype),
        grid_spec=pltpu.PrefetchScalarGridSpec(
            num_scalar_prefetch=0,
            grid=(N // tm, N // tk),          # reduction axis last
            in_specs=in_specs,
            out_specs=pl.BlockSpec((tm, H), lambda i, k: (i, 0)),
            scratch_shapes=[pltpu.VMEM((tm, F), jnp.float32)],
        ),
        compiler_params=pltpu.CompilerParams(
            dimension_semantics=("parallel", "arbitrary"),
            # 48 MB is safe on every generation (v7x: 64 MiB/TC) and does not cap
            # the larger adjacency tiles like the 32 MB scoped default did.
            vmem_limit_bytes=48 * 1024 * 1024 if vmem_limit_bytes is None
            else vmem_limit_bytes,
        ),
    )(*in_arrays)


def encoder_forward(x, params, *, edge_index=None, adj=None, tm=None, tk=None,
                    vmem_limit_bytes=None):
    """x: [N, F_in] f32.  Pass a cached int8 `adj` (from build_adjacency) to keep
    the O(N^2) adjacency build out of the per-call path; edge_index [2, E] int32
    (row 0 = source, row 1 = target) is accepted as a convenience fallback."""
    N, _ = x.shape
    H = params["w1_l"].shape[1]

    if adj is None:
        adj, _ = build_adjacency(edge_index, N)

    # Fold BatchNorm (eval) into the SAGE weights / biases.
    eps = 1e-5
    s1 = params["bn1_gamma"] / jnp.sqrt(params["bn1_var"] + eps)
    t1 = params["bn1_beta"] - params["bn1_mean"] * s1
    s2 = params["bn2_gamma"] / jnp.sqrt(params["bn2_var"] + eps)
    t2 = params["bn2_beta"] - params["bn2_mean"] * s2

    w1l, w1r, b1 = params["w1_l"] * s1, params["w1_r"] * s1, params["b1_l"] * s1 + t1
    w2l, w2r, b2 = params["w2_l"] * s2, params["w2_r"] * s2, params["b2_l"] * s2 + t2

    tm = tm or _pick_row_tile(N)
    tk = tk or _pick_col_tile(N)

    # Layer 1: f32 aggregation (raw features), bf16 output (unit-normalized).
    h = _sage_layer(adj, x, w1l, w1r, b1,
                    tm=tm, tk=tk, agg_dtype=jnp.float32, out_dtype=jnp.bfloat16,
                    vmem_limit_bytes=vmem_limit_bytes)
    # Layer 2 (+ fused post_linear): bf16 x bf16 aggregation, f32 accumulation.
    out = _sage_layer(adj, h, w2l, w2r, b2, params["w3"], params["b3"],
                      tm=tm, tk=tk, agg_dtype=jnp.bfloat16, out_dtype=jnp.float32,
                      vmem_limit_bytes=vmem_limit_bytes)
    return out


# ----------------------------- pure-JAX reference ------------------------------

def _leaky_relu(x, slope=0.01):
    return jnp.where(x > 0, x, slope * x)


def _l2_normalize(x, eps=1e-12):
    norm = jnp.sqrt(jnp.sum(x * x, axis=-1, keepdims=True))
    return x / jnp.maximum(norm, eps)


def encoder_reference(x, edge_index, params):
    N = x.shape[0]
    src, dst = edge_index[0], edge_index[1]
    adj = jnp.zeros((N, N), jnp.float32).at[dst, src].add(1.0)
    eps = 1e-5

    def sage(xin, wl, bl, wr):
        return adj @ xin @ wl + bl + xin @ wr

    h = sage(x, params["w1_l"], params["b1_l"], params["w1_r"])
    h = (h - params["bn1_mean"]) / jnp.sqrt(params["bn1_var"] + eps) * params["bn1_gamma"] + params["bn1_beta"]
    h = _leaky_relu(h)
    h = _l2_normalize(h)
    h = sage(h, params["w2_l"], params["b2_l"], params["w2_r"])
    h = (h - params["bn2_mean"]) / jnp.sqrt(params["bn2_var"] + eps) * params["bn2_gamma"] + params["bn2_beta"]
    h = _leaky_relu(h)
    h = _l2_normalize(h)
    return h @ params["w3"] + params["b3"]


def init_params(key, f_in, hidden=32):
    ks = jax.random.split(key, 8)
    u = lambda k, shape, scale: jax.random.uniform(k, shape, jnp.float32, -scale, scale)
    return {
        # SAGEConv weights stored as [in, out] (already transposed vs. torch Linear).
        "w1_l": u(ks[0], (f_in, hidden), 0.3), "b1_l": u(ks[1], (hidden,), 0.1),
        "w1_r": u(ks[2], (f_in, hidden), 0.3),
        "w2_l": u(ks[3], (hidden, hidden), 0.2), "b2_l": u(ks[4], (hidden,), 0.1),
        "w2_r": u(ks[5], (hidden, hidden), 0.2),
        "w3": u(ks[6], (hidden, hidden), 0.2), "b3": u(ks[7], (hidden,), 0.1),
        # BatchNorm running stats / affine (non-trivial deterministic values).
        "bn1_gamma": jnp.linspace(0.8, 1.2, hidden, dtype=jnp.float32),
        "bn1_beta": jnp.linspace(-0.1, 0.1, hidden, dtype=jnp.float32),
        "bn1_mean": jnp.linspace(-0.2, 0.2, hidden, dtype=jnp.float32),
        "bn1_var": jnp.linspace(0.5, 1.5, hidden, dtype=jnp.float32),
        "bn2_gamma": jnp.linspace(1.1, 0.9, hidden, dtype=jnp.float32),
        "bn2_beta": jnp.linspace(0.05, -0.05, hidden, dtype=jnp.float32),
        "bn2_mean": jnp.linspace(0.1, -0.1, hidden, dtype=jnp.float32),
        "bn2_var": jnp.linspace(0.9, 1.1, hidden, dtype=jnp.float32),
    }


if __name__ == "__main__":
    key = jax.random.PRNGKey(0)
    k_x, k_src, k_dst, k_p = jax.random.split(key, 4)

    # Small but tile-exercising: N=256 -> tm=128 (two "parallel" row tiles), tk=256.
    N, F_IN, HIDDEN, E = 256, 8, 32, 1024
    x = jax.random.normal(k_x, (N, F_IN), jnp.float32)
    edge_index = jnp.stack(
        [
            jax.random.randint(k_src, (E,), 0, N, jnp.int32),
            jax.random.randint(k_dst, (E,), 0, N, jnp.int32),
        ],
        axis=0,
    )
    params = init_params(k_p, F_IN, HIDDEN)

    # Build + cache the compact int8 adjacency once (outside the per-forward path).
    adj, max_mult = build_adjacency(edge_index, N)
    assert int(max_mult) <= 127, "edge multiplicity exceeds int8 adjacency storage"

    out = jax.block_until_ready(encoder_forward(x, params, adj=adj))
    ref = encoder_reference(x, edge_index, params)

    assert out.shape == (N, HIDDEN), out.shape
    max_err = float(jnp.max(jnp.abs(out - ref)))
    # Layer-2 aggregation + the stored intermediate h run in bf16 (unit-normalized,
    # per perf review), so compare at a bf16-appropriate tolerance.
    assert jnp.allclose(out, ref, atol=1e-2, rtol=1e-2), max_err
    print("KERNEL_OK")
</pallas_src>

<mosaic_0001>
module attributes {stable_mosaic.version = 11 : i64} {
  func.func @_sage_layer_kernel(%arg0: i32, %arg1: i32, %arg2: memref<128x256xi8, #tpu.memory_space<vmem>>, %arg3: memref<256x8xf32, #tpu.memory_space<vmem>>, %arg4: memref<128x8xf32, #tpu.memory_space<vmem>>, %arg5: memref<8x32xf32, #tpu.memory_space<vmem>>, %arg6: memref<8x32xf32, #tpu.memory_space<vmem>>, %arg7: memref<1x32xf32, #tpu.memory_space<vmem>>, %arg8: memref<128x32xbf16, #tpu.memory_space<vmem>>, %arg9: memref<128x8xf32, #tpu.memory_space<vmem>>) attributes {dimension_semantics = [#tpu.dimension_semantics<parallel>, #tpu.dimension_semantics<arbitrary>], iteration_bounds = array<i64: 2, 1>, scalar_prefetch = 0 : i64, scratch_operands = 1 : i64, tpu.core_type = #tpu.core_type<tc>, window_params = [{transform_indices = @transform_0, window_bounds = array<i64: 128, 256>}, {transform_indices = @transform_1, window_bounds = array<i64: 256, 8>}, {transform_indices = @transform_2, window_bounds = array<i64: 128, 8>}, {pipeline_mode = #tpu.pipeline_mode<synchronous>, transform_indices = @transform_3, window_bounds = array<i64: 8, 32>}, {pipeline_mode = #tpu.pipeline_mode<synchronous>, transform_indices = @transform_4, window_bounds = array<i64: 8, 32>}, {pipeline_mode = #tpu.pipeline_mode<synchronous>, transform_indices = @transform_5, window_bounds = array<i64: 1, 32>}, {transform_indices = @transform_6, window_bounds = array<i64: 128, 32>}]} {
    %c0_i32 = arith.constant 0 : i32
    %0 = arith.cmpi eq, %arg1, %c0_i32 : i32
    %1 = arith.extui %0 : i1 to i32
    %c0_i32_0 = arith.constant 0 : i32
    %2 = arith.cmpi ne, %1, %c0_i32_0 : i32
    scf.if %2 {
      %cst_10 = arith.constant 0.000000e+00 : f32
      %13 = vector.broadcast %cst_10 : f32 to vector<128x8xf32>
      %c0_11 = arith.constant 0 : index
      %c0_12 = arith.constant 0 : index
      %14 = vector.load %arg9[%c0_11, %c0_12] : memref<128x8xf32, #tpu.memory_space<vmem>>, vector<128x8xf32>
      tpu.vector_store %arg9[%c0_11, %c0_12], %13 {strides = array<i32>} : memref<128x8xf32, #tpu.memory_space<vmem>>, vector<128x8xf32>,
    } else {
    }
    %c0 = arith.constant 0 : index
    %c0_1 = arith.constant 0 : index
    %3 = vector.load %arg2[%c0, %c0_1] : memref<128x256xi8, #tpu.memory_space<vmem>>, vector<128x256xi8>
    %4 = arith.sitofp %3 : vector<128x256xi8> to vector<128x256xf32>
    %c0_2 = arith.constant 0 : index
    %c0_3 = arith.constant 0 : index
    %5 = vector.load %arg3[%c0_2, %c0_3] : memref<256x8xf32, #tpu.memory_space<vmem>>, vector<256x8xf32>
    %c0_4 = arith.constant 0 : index
    %c0_5 = arith.constant 0 : index
    %6 = vector.load %arg9[%c0_4, %c0_5] : memref<128x8xf32, #tpu.memory_space<vmem>>, vector<128x8xf32>
    %cst = arith.constant dense<0.000000e+00> : vector<128x8xf32>
    %7 = tpu.matmul %4, %5, %cst {dimension_numbers = #tpu.dot_dimension_numbers<[1], [0], [0], [1], [0, 0, 1, 1], [], []>} : vector<128x256xf32>, vector<256x8xf32>, vector<128x8xf32> -> vector<128x8xf32>
    %8 = arith.addf %6, %7 : vector<128x8xf32>
    %c0_6 = arith.constant 0 : index
    %c0_7 = arith.constant 0 : index
    %9 = vector.load %arg9[%c0_6, %c0_7] : memref<128x8xf32, #tpu.memory_space<vmem>>, vector<128x8xf32>
    tpu.vector_store %arg9[%c0_6, %c0_7], %8 {strides = array<i32>} : memref<128x8xf32, #tpu.memory_space<vmem>>, vector<128x8xf32>,
    %c0_i32_8 = arith.constant 0 : i32
    %10 = arith.cmpi eq, %arg1, %c0_i32_8 : i32
    %11 = arith.extui %10 : i1 to i32
    %c0_i32_9 = arith.constant 0 : i32
    %12 = arith.cmpi ne, %11, %c0_i32_9 : i32
    scf.if %12 {
      %c0_10 = arith.constant 0 : index
      %c0_11 = arith.constant 0 : index
      %13 = vector.load %arg4[%c0_10, %c0_11] : memref<128x8xf32, #tpu.memory_space<vmem>>, vector<128x8xf32>
      %c0_12 = arith.constant 0 : index
      %c0_13 = arith.constant 0 : index
      %14 = vector.load %arg9[%c0_12, %c0_13] : memref<128x8xf32, #tpu.memory_space<vmem>>, vector<128x8xf32>
      %c0_14 = arith.constant 0 : index
      %c0_15 = arith.constant 0 : index
      %15 = vector.load %arg5[%c0_14, %c0_15] : memref<8x32xf32, #tpu.memory_space<vmem>>, vector<8x32xf32>
      %cst_16 = arith.constant dense<0.000000e+00> : vector<128x32xf32>
      %16 = tpu.matmul %14, %15, %cst_16 {dimension_numbers = #tpu.dot_dimension_numbers<[1], [0], [0], [1], [0, 0, 1, 1], [], []>} : vector<128x8xf32>, vector<8x32xf32>, vector<128x32xf32> -> vector<128x32xf32>
      %c0_17 = arith.constant 0 : index
      %c0_18 = arith.constant 0 : index
      %17 = vector.load %arg6[%c0_17, %c0_18] : memref<8x32xf32, #tpu.memory_space<vmem>>, vector<8x32xf32>
      %cst_19 = arith.constant dense<0.000000e+00> : vector<128x32xf32>
      %18 = tpu.matmul %13, %17, %cst_19 {dimension_numbers = #tpu.dot_dimension_numbers<[1], [0], [0], [1], [0, 0, 1, 1], [], []>} : vector<128x8xf32>, vector<8x32xf32>, vector<128x32xf32> -> vector<128x32xf32>
      %19 = arith.addf %16, %18 : vector<128x32xf32>
      %c0_20 = arith.constant 0 : index
      %c0_21 = arith.constant 0 : index
      %20 = vector.load %arg7[%c0_20, %c0_21] : memref<1x32xf32, #tpu.memory_space<vmem>>, vector<1x32xf32>
      %21 = vector.broadcast %20 : vector<1x32xf32> to vector<128x32xf32>
      %22 = arith.addf %19, %21 : vector<128x32xf32>
      %cst_22 = arith.constant 0.000000e+00 : f32
      %23 = vector.broadcast %cst_22 : f32 to vector<128x32xf32>
      %24 = arith.cmpf ogt, %22, %23 : vector<128x32xf32>
      %cst_23 = arith.constant 0.00999999977 : f32
      %25 = vector.broadcast %cst_23 : f32 to vector<128x32xf32>
      %26 = arith.mulf %25, %22 : vector<128x32xf32>
      %27 = arith.select %24, %22, %26 : vector<128x32xi1>, vector<128x32xf32>
      %28 = arith.mulf %27, %27 : vector<128x32xf32>
      %cst_24 = arith.constant dense<0.000000e+00> : vector<128xf32>
      %29 = vector.multi_reduction <add>, %28, %cst_24 [1] : vector<128x32xf32> to vector<128xf32>
      %30 = vector.shape_cast %29 : vector<128xf32> to vector<128x1xf32>
      %cst_25 = arith.constant 1.000000e-24 : f32
      %31 = vector.broadcast %cst_25 : f32 to vector<128x1xf32>
      %32 = arith.maximumf %30, %31 : vector<128x1xf32>
      %33 = math.rsqrt %32 : vector<128x1xf32>
      %34 = vector.broadcast %33 : vector<128x1xf32> to vector<128x32xf32>
      %35 = arith.mulf %27, %34 : vector<128x32xf32>
      %36 = arith.truncf %35 : vector<128x32xf32> to vector<128x32xbf16>
      %c0_26 = arith.constant 0 : index
      %c0_27 = arith.constant 0 : index
      %37 = vector.load %arg8[%c0_26, %c0_27] : memref<128x32xbf16, #tpu.memory_space<vmem>>, vector<128x32xbf16>
      tpu.vector_store %arg8[%c0_26, %c0_27], %36 {strides = array<i32>} : memref<128x32xbf16, #tpu.memory_space<vmem>>, vector<128x32xbf16>,
    } else {
    }
    return
  }
  func.func @transform_0(%arg0: i32, %arg1: i32) -> (i32, i32) {
    %c0_i32 = arith.constant 0 : i32
    return %arg0, %arg1 : i32, i32
  }
  func.func @transform_1(%arg0: i32, %arg1: i32) -> (i32, i32) {
    %c0_i32 = arith.constant 0 : i32
    %c0_i32_0 = arith.constant 0 : i32
    return %arg1, %c0_i32 : i32, i32
  }
  func.func @transform_2(%arg0: i32, %arg1: i32) -> (i32, i32) {
    %c0_i32 = arith.constant 0 : i32
    %c0_i32_0 = arith.constant 0 : i32
    return %arg0, %c0_i32 : i32, i32
  }
  func.func @transform_3(%arg0: i32, %arg1: i32) -> (i32, i32) {
    %c0_i32 = arith.constant 0 : i32
    %c0_i32_0 = arith.constant 0 : i32
    %c0_i32_1 = arith.constant 0 : i32
    return %c0_i32, %c0_i32_0 : i32, i32
  }
  func.func @transform_4(%arg0: i32, %arg1: i32) -> (i32, i32) {
    %c0_i32 = arith.constant 0 : i32
    %c0_i32_0 = arith.constant 0 : i32
    %c0_i32_1 = arith.constant 0 : i32
    return %c0_i32, %c0_i32_0 : i32, i32
  }
  func.func @transform_5(%arg0: i32, %arg1: i32) -> (i32, i32) {
    %c0_i32 = arith.constant 0 : i32
    %c0_i32_0 = arith.constant 0 : i32
    %c0_i32_1 = arith.constant 0 : i32
    return %c0_i32, %c0_i32_0 : i32, i32
  }
  func.func @transform_6(%arg0: i32, %arg1: i32) -> (i32, i32) {
    %c0_i32 = arith.constant 0 : i32
    %c0_i32_0 = arith.constant 0 : i32
    return %arg0, %c0_i32 : i32, i32
  }
}

</mosaic_0001>

<bundles_post_ra>
// kernel: tpu_custom_call.1
= control target key start
LH: loop header
LB: loop body
LE: loop exit
PB: predicated region body
PF: predicated region fallthrough
CT: control target
= control target key end

     0   :  { %s1519_s21 = smov 0   ;;  %s1521_s22 = smov 0   ;;  %s1908_s0 = inlined_call_operand.vmem [shape: s8[256,256], index: 0, kind: input, shape index: {}]   ;;  %s1909_s1 = inlined_call_operand.vmem [shape: f32[256,8], index: 1, kind: input, shape index: {}]   ;;  %s1910_s2 = inlined_call_operand.vmem [shape: f32[256,8], index: 2, kind: input, shape index: {}]   ;;  %s1911_s3 = inlined_call_operand.vmem [shape: f32[8,32], index: 3, kind: input, shape index: {}]   ;;  %s1912_s4 = inlined_call_operand.vmem [shape: f32[8,32], index: 4, kind: input, shape index: {}]   ;;  %s1913_s5 = inlined_call_operand.vmem [shape: f32[1,32], index: 5, kind: input, shape index: {}]   ;;  %s1914_s6 = inlined_call_operand.vmem [shape: bf16[256,32], index: 6, kind: output, shape index: {}]  }
   0x1   :  { %s1523_s23 = smov 0  }
   0x2 LB: > { %s28_s24 = sadd.s32 1, %s1477_s22  ;;  %p1358_p0 = scmp.ge.s32.totalorder %s1481_s23, 1  ;;  %s1481_s23 = sphi %s1523_s23, %s16_s23   ;;  %s1477_s22 = sphi %s1521_s22, %s1916_s22   ;;  %s1473_s21 = sphi %s1519_s21, %s1915_s21  }
   0x3   : > { %p30_p1 = scmp.ge.s32.totalorder %s28_s24, 2  ;;  %p255_p2 = scmp.lt.s32.totalorder %s1481_s23, 3 }
   0x5   : > { %s1918_s24 = smov (%p30_p1, %s28_s24), 0  ;;  %p256_p3 = pnand %p1358_p0, %p255_p2 }
   0x6   : > { %s1359_s17 = sshll.u32 (!%p256_p3), %s1473_s21, 2  ;;  %s1362_s11 = sshll.u32 (!%p256_p3), %s1473_s21, 4 }
   0x7   : > { %259 = sbr.rel (%p256_p3) target bundleno = 586 (0x24a), region = 44  ;;  %p302_p4 = scmp.lt.s32.totalorder (!%p256_p3), %s1359_s17, 7 }
   0x8   : > { %p319_p5 = scmp.lt.s32.totalorder (!%p256_p3), %s1362_s11, 31 }
   0xc   : > { %v438_v0 = vld [vmem:[%s1909_s1 + $0x78] sm:$0xff]  ;;  %v437_v2 = vld [vmem:[%s1909_s1 + $0x70] sm:$0xff]  ;;  %v436_v4 = vld [vmem:[%s1909_s1 + $0x68] sm:$0xff]  ;;  %s1920_s17 = smov (!%p302_p4, %s1359_s17), 7  ;;  %vm334_vm0 = vcmask 64512   ;;  %s1922_s11 = smov (!%p319_p5, %s1362_s11), 31 }
   0xd   : > { %v454_v1 = vld [vmem:[%s1909_s1 + $0xf8] sm:$0xff]  ;;  %471 = vmatpush.msra.mxu0 %v438_v0  ;;  %v453_v3 = vld [vmem:[%s1909_s1 + $0xf0] sm:$0xff]  ;;  %v452_v5 = vld [vmem:[%s1909_s1 + $0xe8] sm:$0xff]  ;;  %s1400_s19 = sshll.u32 %s1920_s17, 4  ;;  %s1363_s21 = sshll.u32 %s1922_s11, 3  ;;  %vm981_vm2 = vcmask 261120  }
   0xe   : > { %536 = vmatpush.msra.mxu1 %v454_v1  ;;  %v435_v6 = vld [vmem:[%s1909_s1 + $0x60] sm:$0xff]  ;;  %v434_v8 = vld [vmem:[%s1909_s1 + $0x58] sm:$0xff]  ;;  %v433_v10 = vld [vmem:[%s1909_s1 + $0x50] sm:$0xff]  ;;  %s1609_s9 = scalar_lea.vmem %s1908_s0, %s1400_s19  ;;  %s1671_s13 = scalar_lea.vmem %s1910_s2, %s1363_s21 }
   0xf   : > { %472 = vmatpush.msra.mxu0 %v437_v2  ;;  %v451_v7 = vld [vmem:[%s1909_s1 + $0xe0] sm:$0xff]  ;;  %v450_v9 = vld [vmem:[%s1909_s1 + $0xd8] sm:$0xff]  ;;  %v449_v11 = vld [vmem:[%s1909_s1 + $0xd0] sm:$0xff]  ;;  %s1365_s25 = sshll.u32 %s1922_s11, 2 }
  0x10   : > { %537 = vmatpush.msra.mxu1 %v453_v3  ;;  %v432_v12 = vld [vmem:[%s1909_s1 + $0x48] sm:$0xff]  ;;  %v431_v14 = vld [vmem:[%s1909_s1 + $0x40] sm:$0xff]  ;;  %v430_v16 = vld [vmem:[%s1909_s1 + $0x38] sm:$0xff]  ;;  %s1850_s28 = scalar_lea.vmem %s1914_s6, %s1365_s25 }
  0x11   : > { %473 = vmatpush.msra.mxu0 %v436_v4  ;;  %v448_v13 = vld [vmem:[%s1909_s1 + $0xc8] sm:$0xff]  ;;  %v447_v15 = vld [vmem:[%s1909_s1 + $0xc0] sm:$0xff]  ;;  %v446_v17 = vld [vmem:[%s1909_s1 + $0xb8] sm:$0xff] }
  0x12   : > { %538 = vmatpush.msra.mxu1 %v452_v5  ;;  %v429_v18 = vld [vmem:[%s1909_s1 + $0x30] sm:$0xff]  ;;  %v428_v20 = vld [vmem:[%s1909_s1 + $0x28] sm:$0xff]  ;;  %v427_v22 = vld [vmem:[%s1909_s1 + $0x20] sm:$0xff] }
  0x13   : > { %474 = vmatpush.msra.mxu0 %v435_v6  ;;  %v445_v19 = vld [vmem:[%s1909_s1 + $0xb0] sm:$0xff]  ;;  %v444_v21 = vld [vmem:[%s1909_s1 + $0xa8] sm:$0xff]  ;;  %v443_v23 = vld [vmem:[%s1909_s1 + $0xa0] sm:$0xff] }
  0x14   : > { %539 = vmatpush.msra.mxu1 %v451_v7  ;;  %v351_v24 = vld [vmem:[%s1609_s9] sm:$0xff]  ;;  %v352_v25 = vld [vmem:[%s1609_s9 + $0x8] sm:$0xff]  ;;  %v426_v26 = vld [vmem:[%s1909_s1 + $0x18] sm:$0xff] }
  0x15   : > { %475 = vmatpush.msra.mxu0 %v434_v8  ;;  %v442_v27 = vld [vmem:[%s1909_s1 + $0x98] sm:$0xff]  ;;  %v425_v28 = vld [vmem:[%s1909_s1 + $0x10] sm:$0xff]  ;;  %v359_v30 = vunpack.c.0.s8 %v351_v24  ;;  %v360_v31 = vunpack.c.0.s8 %v352_v25  ;;  %v424_v32 = vld [vmem:[%s1909_s1 + $0x8] sm:$0xff]  ;;  %v361_v38 = vunpack.c.1.s8 %v351_v24  ;;  %v362_v39 = vunpack.c.1.s8 %v352_v25 }
  0x16   : > { %540 = vmatpush.msra.mxu1 %v450_v9  ;;  %v441_v29 = vld [vmem:[%s1909_s1 + $0x90] sm:$0xff]  ;;  %v440_v33 = vld [vmem:[%s1909_s1 + $0x88] sm:$0xff]  ;;  %v423_v34 = vld [vmem:[%s1909_s1] sm:$0xff]  ;;  %v363_v42 = vunpack.c.2.s8 %v351_v24  ;;  %v364_v43 = vunpack.c.2.s8 %v352_v25  ;;  %v365_v46 = vunpack.c.3.s8 %v351_v24  ;;  %v366_v47 = vunpack.c.3.s8 %v352_v25 }
  0x17   : > { %476 = vmatpush.msra.mxu0 %v433_v10  ;;  %v439_v35 = vld [vmem:[%s1909_s1 + $0x80] sm:$0xff]  ;;  %v391_v36 = vcvt.s32.f32 %v359_v30  ;;  %v392_v37 = vcvt.s32.f32 %v360_v31  ;;  %v393_v40 = vcvt.s32.f32 %v361_v38  ;;  %v394_v41 = vcvt.s32.f32 %v362_v39  ;;  %v353_v50 = vld [vmem:[%s1609_s9 + $0x10] sm:$0xff]  ;;  %v354_v51 = vld [vmem:[%s1609_s9 + $0x18] sm:$0xff] }
  0x18   : > { %541 = vmatpush.msra.mxu1 %v449_v11  ;;  %v395_v44 = vcvt.s32.f32 %v363_v42  ;;  %v396_v45 = vcvt.s32.f32 %v364_v43  ;;  %v397_v48 = vcvt.s32.f32 %v365_v46  ;;  %v398_v49 = vcvt.s32.f32 %v366_v47  ;;  %v355_v4 = vld [vmem:[%s1609_s9 + $0x20] sm:$0xff]  ;;  %v356_v5 = vld [vmem:[%s1609_s9 + $0x28] sm:$0xff] }
  0x19   : > { %477 = vmatpush.msra.mxu0 %v432_v12  ;;  %v367_v52 = vunpack.c.0.s8 %v353_v50  ;;  %v368_v53 = vunpack.c.0.s8 %v354_v51  ;;  %v369_v56 = vunpack.c.1.s8 %v353_v50  ;;  %v370_v57 = vunpack.c.1.s8 %v354_v51  ;;  %v638_v42 = vld [vmem:[%s1671_s13 + $0x8] sm:$0xff] }
  0x1a   : > { %542 = vmatpush.msra.mxu1 %v448_v13  ;;  %v371_v60 = vunpack.c.2.s8 %v353_v50  ;;  %v372_v61 = vunpack.c.2.s8 %v354_v51  ;;  %v373_v0 = vunpack.c.3.s8 %v353_v50  ;;  %v374_v1 = vunpack.c.3.s8 %v354_v51  ;;  %v640_v51 = vld [vmem:[%s1671_s13 + $0x18] sm:$0xff] }
  0x1b   : > { %478 = vmatpush.msra.mxu0 %v431_v14  ;;  %v399_v54 = vcvt.s32.f32 %v367_v52  ;;  %v400_v55 = vcvt.s32.f32 %v368_v53  ;;  %v401_v58 = vcvt.s32.f32 %v369_v56  ;;  %v402_v59 = vcvt.s32.f32 %v370_v57 }
  0x1c   : > { %543 = vmatpush.msra.mxu1 %v447_v15  ;;  %v403_v62 = vcvt.s32.f32 %v371_v60  ;;  %v404_v63 = vcvt.s32.f32 %v372_v61  ;;  %v405_v2 = vcvt.s32.f32 %v373_v0  ;;  %v406_v3 = vcvt.s32.f32 %v374_v1  ;;  %v642_v1 = vld [vmem:[%s1671_s13 + $0x28] sm:$0xff] }
  0x1d   : > { %479 = vmatpush.msra.mxu0 %v430_v16  ;;  %v375_v6 = vunpack.c.0.s8 %v355_v4  ;;  %v376_v7 = vunpack.c.0.s8 %v356_v5  ;;  %v377_v10 = vunpack.c.1.s8 %v355_v4  ;;  %v378_v11 = vunpack.c.1.s8 %v356_v5 }
  0x1e   : > { %544 = vmatpush.msra.mxu1 %v446_v17  ;;  %v379_v14 = vunpack.c.2.s8 %v355_v4  ;;  %v380_v15 = vunpack.c.2.s8 %v356_v5 }
  0x1f   : > { %480 = vmatpush.msra.mxu0 %v429_v18  ;;  %v407_v8 = vcvt.s32.f32 %v375_v6  ;;  %v408_v9 = vcvt.s32.f32 %v376_v7  ;;  %v409_v12 = vcvt.s32.f32 %v377_v10  ;;  %v410_v13 = vcvt.s32.f32 %v378_v11 }
  0x20   : > { %545 = vmatpush.msra.mxu1 %v445_v19  ;;  %v411_v16 = vcvt.s32.f32 %v379_v14  ;;  %v412_v17 = vcvt.s32.f32 %v380_v15  ;;  %v381_v18 = vunpack.c.3.s8 %v355_v4  ;;  %v382_v19 = vunpack.c.3.s8 %v356_v5  ;;  %v644_v15 = vld [vmem:[%s1671_s13 + $0x38] sm:$0xff] }
  0x21   : > { %481 = vmatpush.msra.mxu0 %v428_v20 }
  0x22   : > { %546 = vmatpush.msra.mxu1 %v444_v21  ;;  %v413_v20 = vcvt.s32.f32 %v381_v18  ;;  %v414_v21 = vcvt.s32.f32 %v382_v19 }
  0x23   : > { %482 = vmatpush.msra.mxu0 %v427_v22  ;;  %v357_v22 = vld [vmem:[%s1609_s9 + $0x30] sm:$0xff] }
  0x24   : > { %547 = vmatpush.msra.mxu1 %v443_v23  ;;  %v358_v23 = vld [vmem:[%s1609_s9 + $0x38] sm:$0xff]  ;;  %v383_v24 = vunpack.c.0.s8 %v357_v22 }
  0x25   : > { %483 = vmatpush.msra.mxu0 %v426_v26  ;;  %v384_v25 = vunpack.c.0.s8 %v358_v23  ;;  %v1483_v26 = vmov 0.0   ;;  %v386_v30 = vunpack.c.1.s8 %v358_v23 }
  0x26   : > { %548 = vmatpush.msra.mxu1 %v442_v27  ;;  %335 = vst.msk [vmem:[#allocation2] sm:$0xff] %vm334_vm0, %v1483_v26  ;;  %v415_v27 = vcvt.s32.f32 %v383_v24 }
  0x27   : > { %484 = vmatpush.msra.mxu0 %v425_v28  ;;  %336 = vst.msk [vmem:[#allocation2 + $0x8] sm:$0xff] %vm334_vm0, %v1483_v26  ;;  %v416_v28 = vcvt.s32.f32 %v384_v25 }
  0x28   : > { %549 = vmatpush.msra.mxu1 %v441_v29  ;;  %337 = vst.msk [vmem:[#allocation2 + $0x10] sm:$0xff] %vm334_vm0, %v1483_v26  ;;  %v385_v29 = vunpack.c.1.s8 %v357_v22 }
  0x29   : > { %485 = vmatpush.msra.mxu0 %v424_v32  ;;  %338 = vst.msk [vmem:[#allocation2 + $0x18] sm:$0xff] %vm334_vm0, %v1483_v26  ;;  %v418_v32 = vcvt.s32.f32 %v386_v30 }
  0x2a   : > { %550 = vmatpush.msra.mxu1 %v440_v33  ;;  %339 = vst.msk [vmem:[#allocation2 + $0x20] sm:$0xff] %vm334_vm0, %v1483_v26  ;;  %v417_v31 = vcvt.s32.f32 %v385_v29  ;;  %v387_v33 = vunpack.c.2.s8 %v357_v22  ;;  %v646_v29 = vld [vmem:[%s1671_s13 + $0x48] sm:$0xff] }
  0x2b   : > { %486 = vmatpush.msra.mxu0 %v423_v34  ;;  %340 = vst.msk [vmem:[#allocation2 + $0x28] sm:$0xff] %vm334_vm0, %v1483_v26  ;;  %v388_v34 = vunpack.c.2.s8 %v358_v23 }
  0x2c   : > { %551 = vmatpush.msra.mxu1 %v439_v35  ;;  %487 = vmatmul.f32.vlgmr.msra.gmra.mxu0 %v391_v36  ;;  %341 = vst.msk [vmem:[#allocation2 + $0x30] sm:$0xff] %vm334_vm0, %v1483_v26  ;;  %v670_v35 = vld [vmem:[%s1912_s4] sm:$0xff]  ;;  %v419_v38 = vcvt.s32.f32 %v387_v33 }
  0x2d   : > { %552 = vmatmul.f32.vlgmr.msra.gmra.mxu1 %v392_v37  ;;  %342 = vst.msk [vmem:[#allocation2 + $0x38] sm:$0xff] %vm334_vm0, %v1483_v26  ;;  %v669_v36 = vld [vmem:[%s1911_s3] sm:$0xff]  ;;  %734 = vmatpush.msra.mxu2 %v670_v35  ;;  %v420_v39 = vcvt.s32.f32 %v388_v34 }
  0x2e   : > { %343 = vst.msk [vmem:[#allocation2 + $0x40] sm:$0xff] %vm334_vm0, %v1483_v26  ;;  %847 = vmatpush.msra.mxu3 %v669_v36  ;;  %v637_v37 = vld [vmem:[%s1671_s13] sm:$0xff]  ;;  %v456_v53 = vld [vmem:[#allocation2 + $0x8] sm:$0xff]  ;;  %v647_v36 = vld [vmem:[%s1671_s13 + $0x50] sm:$0xff] }
  0x2f   : > { %344 = vst.msk [vmem:[#allocation2 + $0x48] sm:$0xff] %vm334_vm0, %v1483_v26  ;;  %1366 = vmatmul.msk.f32.vlgmr.msra.gmra.mxu2 %vm334_vm0, %v637_v37  ;;  %v455_v47 = vld [vmem:[#allocation2] sm:$0xff]  ;;  %v457_v60 = vld [vmem:[#allocation2 + $0x10] sm:$0xff] }
  0x30   : > { %345 = vst.msk [vmem:[#allocation2 + $0x50] sm:$0xff] %vm334_vm0, %v1483_v26 }
  0x31   : > { %346 = vst.msk [vmem:[#allocation2 + $0x58] sm:$0xff] %vm334_vm0, %v1483_v26  ;;  %v459_v10 = vld [vmem:[#allocation2 + $0x20] sm:$0xff] }
  0x32   : > { %347 = vst.msk [vmem:[#allocation2 + $0x60] sm:$0xff] %vm334_vm0, %v1483_v26 }
  0x33   : > { %348 = vst.msk [vmem:[#allocation2 + $0x68] sm:$0xff] %vm334_vm0, %v1483_v26  ;;  %v461_v24 = vld [vmem:[#allocation2 + $0x30] sm:$0xff] }
  0x34   : > { %490 = vmatmul.f32.gmra.mxu0 %v393_v40  ;;  %349 = vst.msk [vmem:[#allocation2 + $0x70] sm:$0xff] %vm334_vm0, %v1483_v26  ;;  %v389_v40 = vunpack.c.3.s8 %v357_v22  ;;  %v645_v22 = vld [vmem:[%s1671_s13 + $0x40] sm:$0xff] }
  0x35   : > { %555 = vmatmul.f32.gmra.mxu1 %v394_v41  ;;  %350 = vst.msk [vmem:[#allocation2 + $0x78] sm:$0xff] %vm334_vm0, %v1483_v26  ;;  %v390_v41 = vunpack.c.3.s8 %v358_v23 }
  0x36   : > { %v421_v43 = vcvt.s32.f32 %v389_v40 }
  0x37   : > { %1367 = vmatmul.msk.f32.gmra.mxu2 %vm334_vm0, %v638_v42 }
  0x3c   : > { %493 = vmatmul.f32.gmra.mxu0 %v395_v44  ;;  %v422_v44 = vcvt.s32.f32 %v390_v41 }
  0x3d   : > { %558 = vmatmul.f32.gmra.mxu1 %v396_v45  ;;  %v639_v45 = vld [vmem:[%s1671_s13 + $0x10] sm:$0xff] }
  0x3f   : > { %1368 = vmatmul.msk.f32.gmra.mxu2 %vm334_vm0, %v639_v45  ;;  %v464_v45 = vld [vmem:[#allocation2 + $0x48] sm:$0xff] }
  0x44   : > { %496 = vmatmul.f32.gmra.mxu0 %v397_v48 }
  0x45   : > { %561 = vmatmul.f32.gmra.mxu1 %v398_v49 }
  0x47   : > { %1369 = vmatmul.msk.f32.gmra.mxu2 %vm334_vm0, %v640_v51 }
  0x4c   : > { %499 = vmatmul.f32.gmra.mxu0 %v399_v54 }
  0x4d   : > { %564 = vmatmul.f32.gmra.mxu1 %v400_v55 }
  0x54   : > { %502 = vmatmul.f32.gmra.mxu0 %v401_v58  ;;  %v641_v58 = vld [vmem:[%s1671_s13 + $0x20] sm:$0xff] }
  0x55   : > { %567 = vmatmul.f32.gmra.mxu1 %v402_v59  ;;  %1370 = vmatmul.msk.f32.gmra.mxu2 %vm334_vm0, %v641_v58 }
  0x5c   : > { %505 = vmatmul.f32.gmra.mxu0 %v403_v62 }
  0x5d   : > { %570 = vmatmul.f32.gmra.mxu1 %v404_v63  ;;  %1371 = vmatmul.msk.f32.gmra.mxu2 %vm334_vm0, %v642_v1 }
  0x64   : > { %508 = vmatmul.f32.gmra.mxu0 %v405_v2 }
  0x65   : > { %573 = vmatmul.f32.gmra.mxu1 %v406_v3  ;;  %v458_v3 = vld [vmem:[#allocation2 + $0x18] sm:$0xff] }
  0x6c   : > { %511 = vmatmul.f32.gmra.mxu0 %v407_v8  ;;  %v643_v8 = vld [vmem:[%s1671_s13 + $0x30] sm:$0xff] }
  0x6d   : > { %576 = vmatmul.f32.gmra.mxu1 %v408_v9  ;;  %1372 = vmatmul.msk.f32.gmra.mxu2 %vm334_vm0, %v643_v8 }
  0x74   : > { %514 = vmatmul.f32.gmra.mxu0 %v409_v12 }
  0x75   : > { %579 = vmatmul.f32.gmra.mxu1 %v410_v13  ;;  %1373 = vmatmul.msk.f32.gmra.mxu2 %vm334_vm0, %v644_v15  ;;  %v469_v15 = vld [vmem:[#allocation2 + $0x70] sm:$0xff] }
  0x7c   : > { %517 = vmatmul.f32.gmra.mxu0 %v411_v16 }
  0x7d   : > { %582 = vmatmul.f32.gmra.mxu1 %v412_v17  ;;  %v460_v17 = vld [vmem:[#allocation2 + $0x28] sm:$0xff]  ;;  %1374 = vmatmul.msk.f32.gmra.mxu2 %vm334_vm0, %v645_v22  ;;  %v470_v22 = vld [vmem:[#allocation2 + $0x78] sm:$0xff] }
  0x84   : > { %520 = vmatmul.f32.gmra.mxu0 %v413_v20 }
  0x85   : > { %585 = vmatmul.f32.gmra.mxu1 %v414_v21  ;;  %1375 = vmatmul.msk.f32.gmra.mxu2 %vm334_vm0, %v646_v29 }
  0x8c   : > { %523 = vmatmul.f32.gmra.mxu0 %v415_v27 }
  0x8d   : > { %588 = vmatmul.f32.gmra.mxu1 %v416_v28  ;;  %1376 = vmatmul.msk.f32.gmra.mxu2 %vm334_vm0, %v647_v36 }
  0x94   : > { %526 = vmatmul.f32.gmra.mxu0 %v417_v31  ;;  %v462_v31 = vld [vmem:[#allocation2 + $0x38] sm:$0xff] }
  0x95   : > { %591 = vmatmul.f32.gmra.mxu1 %v418_v32 }
  0x9c   : > { %529 = vmatmul.f32.gmra.mxu0 %v419_v38  ;;  %v463_v38 = vld [vmem:[#allocation2 + $0x40] sm:$0xff] }
  0x9d   : > { %594 = vmatmul.f32.gmra.mxu1 %v420_v39 }
  0xa4   : > { %532 = vmatmul.f32.gmra.mxu0 %v421_v43  ;;  %v648_v43 = vld [vmem:[%s1671_s13 + $0x58] sm:$0xff] }
  0xa5   : > { %597 = vmatmul.f32.gmra.mxu1 %v422_v44  ;;  %1377 = vmatmul.msk.f32.gmra.mxu2 %vm334_vm0, %v648_v43 }
  0xa9   : > { %v488_v46 = vpop.f32.mrf.mxu0 }
  0xaa   : > { %v553_v48 = vpop.f32.mrf.mxu1 }
  0xab   : > { %v554_v49 = vadd.f32 %v553_v48, %v488_v46 }
  0xad   : > { %v601_v50 = vadd.f32 %v554_v49, %v455_v47 }
  0xaf   : > { %618 = vst.msk [vmem:[#allocation2] sm:$0xff] %vm334_vm0, %v601_v50  ;;  %v649_v50 = vld [vmem:[%s1671_s13 + $0x60] sm:$0xff] }
  0xb0   : > { %1378 = vmatmul.msk.f32.gmra.mxu2 %vm334_vm0, %v649_v50 }
  0xb1   : > { %v491_v52 = vpop.f32.mrf.mxu0 }
  0xb2   : > { %v556_v54 = vpop.f32.mrf.mxu1 }
  0xb3   : > { %v557_v55 = vadd.f32 %v556_v54, %v491_v52  ;;  %v465_v52 = vld [vmem:[#allocation2 + $0x50] sm:$0xff] }
  0xb5   : > { %v602_v56 = vadd.f32 %v557_v55, %v456_v53 }
  0xb6   : > { %v653_v57 = vld [vmem:[#allocation2] sm:$0xff] }
  0xb7   : > { %619 = vst.msk [vmem:[#allocation2 + $0x8] sm:$0xff] %vm334_vm0, %v602_v56  ;;  %1382 = vmatmul.msk.f32.vlgmr.msra.gmra.mxu3 %vm334_vm0, %v653_v57  ;;  %v650_v57 = vld [vmem:[%s1671_s13 + $0x68] sm:$0xff] }
  0xb8   : > { %1379 = vmatmul.msk.f32.gmra.mxu2 %vm334_vm0, %v650_v57 }
  0xb9   : > { %v494_v59 = vpop.f32.mrf.mxu0 }
  0xba   : > { %v559_v61 = vpop.f32.mrf.mxu1 }
  0xbb   : > { %v560_v62 = vadd.f32 %v559_v61, %v494_v59  ;;  %v466_v59 = vld [vmem:[#allocation2 + $0x58] sm:$0xff] }
  0xbd   : > { %v603_v63 = vadd.f32 %v560_v62, %v457_v60 }
  0xbe   : > { %v654_v0 = vld [vmem:[#allocation2 + $0x8] sm:$0xff] }
  0xbf   : > { %620 = vst.msk [vmem:[#allocation2 + $0x10] sm:$0xff] %vm334_vm0, %v603_v63  ;;  %1383 = vmatmul.msk.f32.gmra.mxu3 %vm334_vm0, %v654_v0  ;;  %v651_v0 = vld [vmem:[%s1671_s13 + $0x70] sm:$0xff] }
  0xc0   : > { %1380 = vmatmul.msk.f32.gmra.mxu2 %vm334_vm0, %v651_v0 }
  0xc1   : > { %v497_v2 = vpop.f32.mrf.mxu0 }
  0xc2   : > { %v562_v4 = vpop.f32.mrf.mxu1 }
  0xc3   : > { %v563_v5 = vadd.f32 %v562_v4, %v497_v2  ;;  %v467_v2 = vld [vmem:[#allocation2 + $0x60] sm:$0xff] }
  0xc5   : > { %v604_v6 = vadd.f32 %v563_v5, %v458_v3  ;;  %v652_v5 = vld [vmem:[%s1671_s13 + $0x78] sm:$0xff] }
  0xc6   : > { %v655_v7 = vld [vmem:[#allocation2 + $0x10] sm:$0xff] }
  0xc7   : > { %621 = vst.msk [vmem:[#allocation2 + $0x18] sm:$0xff] %vm334_vm0, %v604_v6  ;;  %1384 = vmatmul.msk.f32.gmra.mxu3 %vm334_vm0, %v655_v7 }
  0xc8   : > { %1381 = vmatmul.msk.f32.gmra.mxu2 %vm334_vm0, %v652_v5 }
  0xc9   : > { %v500_v9 = vpop.f32.mrf.mxu0 }
  0xca   : > { %v565_v11 = vpop.f32.mrf.mxu1 }
  0xcb   : > { %v566_v12 = vadd.f32 %v565_v11, %v500_v9  ;;  %v468_v9 = vld [vmem:[#allocation2 + $0x68] sm:$0xff] }
  0xcd   : > { %v605_v13 = vadd.f32 %v566_v12, %v459_v10 }
  0xce   : > { %v656_v14 = vld [vmem:[#allocation2 + $0x18] sm:$0xff] }
  0xcf   : > { %622 = vst.msk [vmem:[#allocation2 + $0x20] sm:$0xff] %vm334_vm0, %v605_v13  ;;  %1385 = vmatmul.msk.f32.gmra.mxu3 %vm334_vm0, %v656_v14 }
  0xd1   : > { %v503_v16 = vpop.f32.mrf.mxu0 }
  0xd2   : > { %v568_v18 = vpop.f32.mrf.mxu1 }
  0xd3   : > { %v569_v19 = vadd.f32 %v568_v18, %v503_v16  ;;  %v736_v18 = vpop.f32.mrf.mxu2 }
  0xd5   : > { %v606_v20 = vadd.f32 %v569_v19, %v460_v17 }
  0xd6   : > { %v657_v21 = vld [vmem:[#allocation2 + $0x20] sm:$0xff] }
  0xd7   : > { %623 = vst.msk [vmem:[#allocation2 + $0x28] sm:$0xff] %vm334_vm0, %v606_v20  ;;  %1386 = vmatmul.msk.f32.gmra.mxu3 %vm334_vm0, %v657_v21 }
  0xd9   : > { %v506_v23 = vpop.f32.mrf.mxu0 }
  0xda   : > { %v571_v25 = vpop.f32.mrf.mxu1 }
  0xdb   : > { %v572_v26 = vadd.f32 %v571_v25, %v506_v23  ;;  %v739_v25 = vpop.f32.mrf.mxu2 }
  0xdd   : > { %v607_v27 = vadd.f32 %v572_v26, %v461_v24 }
  0xde   : > { %v658_v28 = vld [vmem:[#allocation2 + $0x28] sm:$0xff] }
  0xdf   : > { %624 = vst.msk [vmem:[#allocation2 + $0x30] sm:$0xff] %vm334_vm0, %v607_v27  ;;  %1387 = vmatmul.msk.f32.gmra.mxu3 %vm334_vm0, %v658_v28 }
  0xe1   : > { %v509_v30 = vpop.f32.mrf.mxu0 }
  0xe2   : > { %v574_v32 = vpop.f32.mrf.mxu1 }
  0xe3   : > { %v575_v33 = vadd.f32 %v574_v32, %v509_v30  ;;  %v742_v29 = vpop.f32.mrf.mxu2 }
  0xe5   : > { %v608_v34 = vadd.f32 %v575_v33, %v462_v31  ;;  %v1747_v31 = vld [vmem:[%s1913_s5] ss:$0 sm:$0xff] }
  0xe6   : > { %v659_v35 = vld [vmem:[#allocation2 + $0x30] sm:$0xff] }
  0xe7   : > { %625 = vst.msk [vmem:[#allocation2 + $0x38] sm:$0xff] %vm334_vm0, %v608_v34  ;;  %1388 = vmatmul.msk.f32.gmra.mxu3 %vm334_vm0, %v659_v35 }
  0xe9   : > { %v512_v37 = vpop.f32.mrf.mxu0 }
  0xea   : > { %v577_v39 = vpop.f32.mrf.mxu1 }
  0xeb   : > { %v578_v40 = vadd.f32 %v577_v39, %v512_v37  ;;  %v745_v30 = vpop.f32.mrf.mxu2 }
  0xed   : > { %v609_v41 = vadd.f32 %v578_v40, %v463_v38 }
  0xee   : > { %v660_v42 = vld [vmem:[#allocation2 + $0x38] sm:$0xff] }
  0xef   : > { %626 = vst.msk [vmem:[#allocation2 + $0x40] sm:$0xff] %vm334_vm0, %v609_v41  ;;  %1389 = vmatmul.msk.f32.gmra.mxu3 %vm334_vm0, %v660_v42 }
  0xf1   : > { %v515_v44 = vpop.f32.mrf.mxu0 }
  0xf2   : > { %v580_v46 = vpop.f32.mrf.mxu1 }
  0xf3   : > { %v581_v47 = vadd.f32 %v580_v46, %v515_v44  ;;  %v748_v39 = vpop.f32.mrf.mxu2 }
  0xf5   : > { %v610_v48 = vadd.f32 %v581_v47, %v464_v45 }
  0xf6   : > { %v661_v49 = vld [vmem:[#allocation2 + $0x40] sm:$0xff] }
  0xf7   : > { %627 = vst.msk [vmem:[#allocation2 + $0x48] sm:$0xff] %vm334_vm0, %v610_v48  ;;  %1390 = vmatmul.msk.f32.gmra.mxu3 %vm334_vm0, %v661_v49 }
  0xf9   : > { %v518_v51 = vpop.f32.mrf.mxu0 }
  0xfa   : > { %v583_v53 = vpop.f32.mrf.mxu1 }
  0xfb   : > { %v584_v54 = vadd.f32 %v583_v53, %v518_v51  ;;  %v751_v49 = vpop.f32.mrf.mxu2 }
  0xfd   : > { %v611_v55 = vadd.f32 %v584_v54, %v465_v52 }
  0xfe   : > { %v662_v56 = vld [vmem:[#allocation2 + $0x48] sm:$0xff] }
  0xff   : > { %628 = vst.msk [vmem:[#allocation2 + $0x50] sm:$0xff] %vm334_vm0, %v611_v55  ;;  %1391 = vmatmul.msk.f32.gmra.mxu3 %vm334_vm0, %v662_v56 }
 0x101   : > { %v521_v58 = vpop.f32.mrf.mxu0 }
 0x102   : > { %v586_v60 = vpop.f32.mrf.mxu1 }
 0x103   : > { %v587_v61 = vadd.f32 %v586_v60, %v521_v58  ;;  %v754_v58 = vpop.f32.mrf.mxu2 }
 0x105   : > { %v612_v62 = vadd.f32 %v587_v61, %v466_v59 }
 0x106   : > { %v663_v63 = vld [vmem:[#allocation2 + $0x50] sm:$0xff] }
 0x107   : > { %629 = vst.msk [vmem:[#allocation2 + $0x58] sm:$0xff] %vm334_vm0, %v612_v62  ;;  %1392 = vmatmul.msk.f32.gmra.mxu3 %vm334_vm0, %v663_v63 }
 0x109   : > { %v524_v1 = vpop.f32.mrf.mxu0 }
 0x10a   : > { %v589_v3 = vpop.f32.mrf.mxu1 }
 0x10b   : > { %v590_v4 = vadd.f32 %v589_v3, %v524_v1  ;;  %v757_v3 = vpop.f32.mrf.mxu2 }
 0x10d   : > { %v613_v6 = vadd.f32 %v590_v4, %v467_v2 }
 0x10e   : > { %v664_v7 = vld [vmem:[#allocation2 + $0x58] sm:$0xff] }
 0x10f   : > { %630 = vst.msk [vmem:[#allocation2 + $0x60] sm:$0xff] %vm334_vm0, %v613_v6  ;;  %1393 = vmatmul.msk.f32.gmra.mxu3 %vm334_vm0, %v664_v7 }
 0x111   : > { %v527_v8 = vpop.f32.mrf.mxu0 }
 0x112   : > { %v592_v10 = vpop.f32.mrf.mxu1 }
 0x113   : > { %v593_v11 = vadd.f32 %v592_v10, %v527_v8 }
 0x115   : > { %v614_v12 = vadd.f32 %v593_v11, %v468_v9 }
 0x116   : > { %v665_v13 = vld [vmem:[#allocation2 + $0x60] sm:$0xff] }
 0x117   : > { %631 = vst.msk [vmem:[#allocation2 + $0x68] sm:$0xff] %vm334_vm0, %v614_v12  ;;  %1394 = vmatmul.msk.f32.gmra.mxu3 %vm334_vm0, %v665_v13 }
 0x119   : > { %v530_v14 = vpop.f32.mrf.mxu0 }
 0x11a   : > { %v595_v16 = vpop.f32.mrf.mxu1 }
 0x11b   : > { %v596_v17 = vadd.f32 %v595_v16, %v530_v14  ;;  %v760_v14 = vpop.f32.mrf.mxu2 }
 0x11d   : > { %v615_v19 = vadd.f32 %v596_v17, %v469_v15 }
 0x11e   : > { %v666_v20 = vld [vmem:[#allocation2 + $0x68] sm:$0xff] }
 0x11f   : > { %632 = vst.msk [vmem:[#allocation2 + $0x70] sm:$0xff] %vm334_vm0, %v615_v19  ;;  %1395 = vmatmul.msk.f32.gmra.mxu3 %vm334_vm0, %v666_v20 }
 0x121   : > { %v533_v21 = vpop.f32.mrf.mxu0 }
 0x122   : > { %v598_v23 = vpop.f32.mrf.mxu1 }
 0x123   : > { %v599_v24 = vadd.f32 %v598_v23, %v533_v21 }
 0x125   : > { %v616_v26 = vadd.f32 %v599_v24, %v470_v22  ;;  %v763_v24 = vpop.f32.mrf.mxu2 }
 0x126   : > { %v667_v27 = vld [vmem:[#allocation2 + $0x70] sm:$0xff] }
 0x127   : > { %633 = vst.msk [vmem:[#allocation2 + $0x78] sm:$0xff] %vm334_vm0, %v616_v26  ;;  %1396 = vmatmul.msk.f32.gmra.mxu3 %vm334_vm0, %v667_v27 }
 0x12e   : > { %v668_v28 = vld [vmem:[#allocation2 + $0x78] sm:$0xff] }
 0x12f   : > { %1397 = vmatmul.msk.f32.gmra.mxu3 %vm334_vm0, %v668_v28 }
 0x13a   : > { %v849_v32 = vpop.f32.mrf.mxu3 }
 0x13b   : > { %v850_v33 = vadd.f32 %v849_v32, %v736_v18 }
 0x13d   : > { %v901_v34 = vadd.f32 %v1747_v31, %v850_v33 }
 0x13f   : > { %v933_v35 = vmul.f32 0.01, %v901_v34  ;;  %vm917_vm1 = vcmp.gt.f32.partialorder %v901_v34, 0.0 }
 0x141   : > { %v1750_v36 = vsel %vm917_vm1, %v901_v34, %v933_v35  ;;  %v766_v34 = vpop.f32.mrf.mxu2 }
 0x142   : > { %v852_v37 = vpop.f32.mrf.mxu3  ;;  %v965_v38 = vmul.f32 %v1750_v36, %v1750_v36 }
 0x143   : > { %v853_v40 = vadd.f32 %v852_v37, %v739_v25 }
 0x144   : > { %v982_v41 = vsel %vm981_vm2, %v965_v38, 0.0 }
 0x145   : > { %v902_v42 = vadd.f32 %v1747_v31, %v853_v40  ;;  %983 = vadd.xlane.f32.xlu0 %v982_v41 }
 0x147   : > { %v934_v43 = vmul.f32 0.01, %v902_v42  ;;  %vm918_vm3 = vcmp.gt.f32.partialorder %v902_v42, 0.0 }
 0x149   : > { %v1756_v44 = vsel %vm918_vm3, %v902_v42, %v934_v43 }
 0x14a   : > { %v855_v45 = vpop.f32.mrf.mxu3  ;;  %v966_v46 = vmul.f32 %v1756_v44, %v1756_v44 }
 0x14b   : > { %v856_v47 = vadd.f32 %v855_v45, %v742_v29  ;;  %v769_v45 = vpop.f32.mrf.mxu2 }
 0x14c   : > { %v985_v48 = vsel %vm981_vm2, %v966_v46, 0.0 }
 0x14d   : > { %v903_v50 = vadd.f32 %v1747_v31, %v856_v47  ;;  %986 = vadd.xlane.f32.xlu0 %v985_v48 }
 0x14f   : > { %v935_v51 = vmul.f32 0.01, %v903_v50  ;;  %vm919_vm4 = vcmp.gt.f32.partialorder %v903_v50, 0.0 }
 0x151   : > { %v1762_v52 = vsel %vm919_vm4, %v903_v50, %v935_v51 }
 0x152   : > { %v858_v53 = vpop.f32.mrf.mxu3  ;;  %v967_v54 = vmul.f32 %v1762_v52, %v1762_v52 }
 0x153   : > { %v859_v55 = vadd.f32 %v858_v53, %v745_v30 }
 0x154   : > { %v988_v56 = vsel %vm981_vm2, %v967_v54, 0.0 }
 0x155   : > { %v904_v57 = vadd.f32 %v1747_v31, %v859_v55  ;;  %989 = vadd.xlane.f32.xlu1 %v988_v56 }
 0x157   : > { %v936_v59 = vmul.f32 0.01, %v904_v57  ;;  %vm920_vm5 = vcmp.gt.f32.partialorder %v904_v57, 0.0 }
 0x159   : > { %v1768_v60 = vsel %vm920_vm5, %v904_v57, %v936_v59  ;;  %v772_v57 = vpop.f32.mrf.mxu2 }
 0x15a   : > { %v861_v61 = vpop.f32.mrf.mxu3  ;;  %v968_v62 = vmul.f32 %v1768_v60, %v1768_v60 }
 0x15b   : > { %v862_v63 = vadd.f32 %v861_v61, %v748_v39 }
 0x15c   : > { %v991_v0 = vsel %vm981_vm2, %v968_v62, 0.0 }
 0x15d   : > { %v905_v1 = vadd.f32 %v1747_v31, %v862_v63  ;;  %992 = vadd.xlane.f32.xlu1 %v991_v0 }
 0x15f   : > { %v937_v2 = vmul.f32 0.01, %v905_v1  ;;  %vm921_vm6 = vcmp.gt.f32.partialorder %v905_v1, 0.0 }
 0x161   : > { %v1774_v4 = vsel %vm921_vm6, %v905_v1, %v937_v2 }
 0x162   : > { %v864_v5 = vpop.f32.mrf.mxu3  ;;  %v969_v6 = vmul.f32 %v1774_v4, %v1774_v4 }
 0x163   : > { %v865_v7 = vadd.f32 %v864_v5, %v751_v49  ;;  %v775_v5 = vpop.f32.mrf.mxu2 }
 0x164   : > { %v994_v8 = vsel %vm981_vm2, %v969_v6, 0.0 }
 0x165   : > { %v906_v9 = vadd.f32 %v1747_v31, %v865_v7  ;;  %995 = vadd.xlane.f32.xlu2 %v994_v8 }
 0x167   : > { %v938_v10 = vmul.f32 0.01, %v906_v9  ;;  %vm922_vm7 = vcmp.gt.f32.partialorder %v906_v9, 0.0 }
 0x169   : > { %v1780_v11 = vsel %vm922_vm7, %v906_v9, %v938_v10 }
 0x16a   : > { %v867_v12 = vpop.f32.mrf.mxu3  ;;  %v970_v13 = vmul.f32 %v1780_v11, %v1780_v11 }
 0x16b   : > { %v868_v15 = vadd.f32 %v867_v12, %v754_v58 }
 0x16c   : > { %v997_v16 = vsel %vm981_vm2, %v970_v13, 0.0 }
 0x16d   : > { %v907_v17 = vadd.f32 %v1747_v31, %v868_v15  ;;  %998 = vadd.xlane.f32.xlu2 %v997_v16  ;;  %v778_v15 = vpop.f32.mrf.mxu2 }
 0x16f   : > { %v939_v18 = vmul.f32 0.01, %v907_v17  ;;  %vm923_vm8 = vcmp.gt.f32.partialorder %v907_v17, 0.0 }
 0x171   : > { %v1786_v19 = vsel %vm923_vm8, %v907_v17, %v939_v18 }
 0x172   : > { %v870_v20 = vpop.f32.mrf.mxu3  ;;  %v971_v21 = vmul.f32 %v1786_v19, %v1786_v19 }
 0x173   : > { %v871_v22 = vadd.f32 %v870_v20, %v757_v3 }
 0x174   : > { %v1000_v23 = vsel %vm981_vm2, %v971_v21, 0.0 }
 0x175   : > { %v908_v25 = vadd.f32 %v1747_v31, %v871_v22  ;;  %1001 = vadd.xlane.f32.xlu0 %v1000_v23 }
 0x177   : > { %v940_v26 = vmul.f32 0.01, %v908_v25  ;;  %vm924_vm9 = vcmp.gt.f32.partialorder %v908_v25, 0.0 }
 0x179   : > { %v1792_v27 = vsel %vm924_vm9, %v908_v25, %v940_v26  ;;  %v781_v25 = vpop.f32.mrf.mxu2 }
 0x17a   : > { %v873_v28 = vpop.f32.mrf.mxu3  ;;  %v972_v29 = vmul.f32 %v1792_v27, %v1792_v27 }
 0x17b   : > { %v874_v30 = vadd.f32 %v873_v28, %v760_v14 }
 0x17c   : > { %v1003_v32 = vsel %vm981_vm2, %v972_v29, 0.0 }
 0x17d   : > { %v909_v33 = vadd.f32 %v1747_v31, %v874_v30  ;;  %1004 = vadd.xlane.f32.xlu1 %v1003_v32 }
 0x17f   : > { %v941_v35 = vmul.f32 0.01, %v909_v33  ;;  %vm925_vm10 = vcmp.gt.f32.partialorder %v909_v33, 0.0 }
 0x181   : > { %v1798_v37 = vsel %vm925_vm10, %v909_v33, %v941_v35 }
 0x182   : > { %v876_v38 = vpop.f32.mrf.mxu3  ;;  %v973_v39 = vmul.f32 %v1798_v37, %v1798_v37 }
 0x183   : > { %v877_v40 = vadd.f32 %v876_v38, %v763_v24 }
 0x184   : > { %v1006_v41 = vsel %vm981_vm2, %v973_v39, 0.0 }
 0x185   : > { %v910_v42 = vadd.f32 %v1747_v31, %v877_v40  ;;  %1007 = vadd.xlane.f32.xlu2 %v1006_v41 }
 0x187   : > { %v942_v43 = vmul.f32 0.01, %v910_v42  ;;  %vm926_vm11 = vcmp.gt.f32.partialorder %v910_v42, 0.0 }
 0x189   : > { %v1804_v46 = vsel %vm926_vm11, %v910_v42, %v942_v43 }
 0x18a   : > { %v879_v47 = vpop.f32.mrf.mxu3  ;;  %v974_v48 = vmul.f32 %v1804_v46, %v1804_v46 }
 0x18b   : > { %v880_v49 = vadd.f32 %v879_v47, %v766_v34 }
 0x18c   : > { %v1009_v50 = vsel %vm981_vm2, %v974_v48, 0.0 }
 0x18d   : > { %v911_v51 = vadd.f32 %v1747_v31, %v880_v49  ;;  %1010 = vadd.xlane.f32.xlu0 %v1009_v50 }
 0x18f   : > { %v943_v53 = vmul.f32 0.01, %v911_v51  ;;  %vm927_vm12 = vcmp.gt.f32.partialorder %v911_v51, 0.0 }
 0x191   : > { %v1810_v54 = vsel %vm927_vm12, %v911_v51, %v943_v53 }
 0x192   : > { %v882_v55 = vpop.f32.mrf.mxu3  ;;  %v975_v56 = vmul.f32 %v1810_v54, %v1810_v54 }
 0x193   : > { %v883_v58 = vadd.f32 %v882_v55, %v769_v45 }
 0x194   : > { %v1012_v59 = vsel %vm981_vm2, %v975_v56, 0.0 }
 0x195   : > { %v912_v61 = vadd.f32 %v1747_v31, %v883_v58  ;;  %1013 = vadd.xlane.f32.xlu1 %v1012_v59 }
 0x197   : > { %v944_v62 = vmul.f32 0.01, %v912_v61  ;;  %vm928_vm13 = vcmp.gt.f32.partialorder %v912_v61, 0.0 }
 0x199   : > { %v1816_v63 = vsel %vm928_vm13, %v912_v61, %v944_v62 }
 0x19a   : > { %v885_v0 = vpop.f32.mrf.mxu3  ;;  %v976_v1 = vmul.f32 %v1816_v63, %v1816_v63 }
 0x19b   : > { %v886_v2 = vadd.f32 %v885_v0, %v772_v57 }
 0x19c   : > { %v1015_v3 = vsel %vm981_vm2, %v976_v1, 0.0 }
 0x19d   : > { %v913_v6 = vadd.f32 %v1747_v31, %v886_v2  ;;  %1016 = vadd.xlane.f32.xlu2 %v1015_v3 }
 0x19f   : > { %v945_v7 = vmul.f32 0.01, %v913_v6  ;;  %vm929_vm14 = vcmp.gt.f32.partialorder %v913_v6, 0.0 }
 0x1a1   : > { %v1822_v8 = vsel %vm929_vm14, %v913_v6, %v945_v7 }
 0x1a2   : > { %v888_v9 = vpop.f32.mrf.mxu3  ;;  %v977_v10 = vmul.f32 %v1822_v8, %v1822_v8 }
 0x1a3   : > { %v889_v12 = vadd.f32 %v888_v9, %v775_v5 }
 0x1a4   : > { %v1018_v13 = vsel %vm981_vm2, %v977_v10, 0.0 }
 0x1a5   : > { %v914_v14 = vadd.f32 %v1747_v31, %v889_v12  ;;  %1019 = vadd.xlane.f32.xlu0 %v1018_v13 }
 0x1a7   : > { %v946_v16 = vmul.f32 0.01, %v914_v14  ;;  %vm930_vm15 = vcmp.gt.f32.partialorder %v914_v14, 0.0 }
 0x1a9   : > { %v1828_v17 = vsel %vm930_vm15, %v914_v14, %v946_v16 }
 0x1aa   : > { %v891_v18 = vpop.f32.mrf.mxu3  ;;  %v978_v20 = vmul.f32 %v1828_v17, %v1828_v17 }
 0x1ab   : > { %v892_v21 = vadd.f32 %v891_v18, %v778_v15 }
 0x1ac   : > { %v1021_v22 = vsel %vm981_vm2, %v978_v20, 0.0 }
 0x1ad   : > { %v915_v23 = vadd.f32 %v1747_v31, %v892_v21  ;;  %1022 = vadd.xlane.f32.xlu1 %v1021_v22 }
 0x1af   : > { %v947_v24 = vmul.f32 0.01, %v915_v23  ;;  %vm931_vm0 = vcmp.gt.f32.partialorder %v915_v23, 0.0 }
 0x1b1   : > { %v1834_v26 = vsel %vm931_vm0, %v915_v23, %v947_v24 }
 0x1b2   : > { %v894_v28 = vpop.f32.mrf.mxu3  ;;  %v979_v29 = vmul.f32 %v1834_v26, %v1834_v26 }
 0x1b3   : > { %v895_v30 = vadd.f32 %v894_v28, %v781_v25 }
 0x1b4   : > { %v1024_v32 = vsel %vm981_vm2, %v979_v29, 0.0 }
 0x1b5   : > { %v916_v33 = vadd.f32 %v1747_v31, %v895_v30  ;;  %1025 = vadd.xlane.f32.xlu2 %v1024_v32 }
 0x1b7   : > { %v948_v34 = vmul.f32 0.01, %v916_v33  ;;  %vm932_vm1 = vcmp.gt.f32.partialorder %v916_v33, 0.0 }
 0x1b8   : > { %v984_v35 = vpop.xlane.xlu0 %983 }
 0x1b9   : > { %v1030_v38 = vmax.f32 %v984_v35, 1e-24  ;;  %v1840_v39 = vsel %vm932_vm1, %v916_v33, %v948_v34 }
 0x1ba   : > { %v980_v40 = vmul.f32 %v1840_v39, %v1840_v39 }
 0x1bb   : > { %1427 = vrsqrt.f32 %v1030_v38  ;;  %vm1052_vm4 = vweird.f32 %v1030_v38 }
 0x1bc   : > { %v1027_v41 = vsel %vm981_vm2, %v980_v40, 0.0  ;;  %vm1238_vm2 = vcmask 257024  }
 0x1bd   : > { %1028 = vadd.xlane.f32.xlu0 %v1027_v41 }
 0x1c0   : > { %v987_v42 = vpop.xlane.xlu0 %986 }
 0x1c1   : > { %v1428_v43 = vpop.eup %1427  ;;  %v1031_v45 = vmax.f32 %v987_v42, 1e-24 }
 0x1c2   : > { %v1047_v47 = vmul.f32 %v1428_v43, %v1030_v38  ;;  %vm1053_vm3 = vweird.f32 %v1428_v43 }
 0x1c3   : > { %1429 = vrsqrt.f32 %v1031_v45  ;;  %vm1054_vm5 = vmor %vm1052_vm4, %vm1053_vm3  ;;  %vm1062_vm7 = vweird.f32 %v1031_v45 }
 0x1c4   : > { %v1048_v31 = vmul.f32 %v1428_v43, %v1047_v47 }
 0x1c6   : > { %v1049_v48 = vmul.f32 0.5, %v1048_v31 }
 0x1c8   : > { %v1050_v49 = vsub.f32 1.5, %v1049_v48  ;;  %v990_v50 = vpop.xlane.xlu1 %989 }
 0x1c9   : > { %v1430_v51 = vpop.eup %1429  ;;  %v1032_v53 = vmax.f32 %v990_v50, 1e-24 }
 0x1ca   : > { %v1051_v55 = vmul.f32 %v1428_v43, %v1050_v49  ;;  %v1057_v56 = vmul.f32 %v1430_v51, %v1031_v45  ;;  %vm1063_vm6 = vweird.f32 %v1430_v51 }
 0x1cb   : > { %1431 = vrsqrt.f32 %v1032_v53  ;;  %vm1064_vm8 = vmor %vm1062_vm7, %vm1063_vm6  ;;  %vm1072_vm10 = vweird.f32 %v1032_v53 }
 0x1cc   : > { %v1055_v57 = vsel %vm1054_vm5, %v1428_v43, %v1051_v55  ;;  %v1058_v58 = vmul.f32 %v1430_v51, %v1057_v56 }
 0x1cd   : > { %v1206_v59 = vmul.f32 %v1055_v57, %v1750_v36 }
 0x1ce   : > { %v1059_v61 = vmul.f32 0.5, %v1058_v58 }
 0x1cf   : > { %v1222_v62 = vpack.c.bf16 %v1206_v59, %v1206_v59 }
 0x1d0   : > { %v1060_v0 = vsub.f32 1.5, %v1059_v61  ;;  %v993_v1 = vpop.xlane.xlu1 %992 }
 0x1d1   : > { %v1432_v2 = vpop.eup %1431  ;;  %1239 = vst.msk [vmem:[%s1850_s28] sm:$0xf] %vm1238_vm2, %v1222_v62  ;;  %v1033_v3 = vmax.f32 %v993_v1, 1e-24 }
 0x1d2   : > { %v1061_v5 = vmul.f32 %v1430_v51, %v1060_v0  ;;  %v1067_v36 = vmul.f32 %v1432_v2, %v1032_v53  ;;  %vm1073_vm9 = vweird.f32 %v1432_v2 }
 0x1d3   : > { %1433 = vrsqrt.f32 %v1033_v3  ;;  %vm1074_vm11 = vmor %vm1072_vm10, %vm1073_vm9  ;;  %vm1082_vm13 = vweird.f32 %v1033_v3 }
 0x1d4   : > { %v1065_v6 = vsel %vm1064_vm8, %v1430_v51, %v1061_v5  ;;  %v1068_v7 = vmul.f32 %v1432_v2, %v1067_v36 }
 0x1d5   : > { %v1207_v9 = vmul.f32 %v1065_v6, %v1756_v44 }
 0x1d6   : > { %v1069_v10 = vmul.f32 0.5, %v1068_v7 }
 0x1d7   : > { %v1223_v12 = vpack.c.bf16 %v1207_v9, %v1207_v9 }
 0x1d8   : > { %v1070_v13 = vsub.f32 1.5, %v1069_v10  ;;  %v996_v14 = vpop.xlane.xlu2 %995 }
 0x1d9   : > { %v1434_v15 = vpop.eup %1433  ;;  %1240 = vst.msk [vmem:[%s1850_s28 + $0x4] sm:$0xf] %vm1238_vm2, %v1223_v12  ;;  %v1034_v16 = vmax.f32 %v996_v14, 1e-24 }
 0x1da   : > { %v1071_v18 = vmul.f32 %v1432_v2, %v1070_v13  ;;  %v1077_v20 = vmul.f32 %v1434_v15, %v1033_v3  ;;  %vm1083_vm12 = vweird.f32 %v1434_v15 }
 0x1db   : > { %1435 = vrsqrt.f32 %v1034_v16  ;;  %vm1084_vm14 = vmor %vm1082_vm13, %vm1083_vm12  ;;  %vm1092_vm0 = vweird.f32 %v1034_v16 }
 0x1dc   : > { %v1075_v21 = vsel %vm1074_vm11, %v1432_v2, %v1071_v18  ;;  %v1078_v22 = vmul.f32 %v1434_v15, %v1077_v20 }
 0x1dd   : > { %v1208_v23 = vmul.f32 %v1075_v21, %v1762_v52 }
 0x1de   : > { %v1079_v44 = vmul.f32 0.5, %v1078_v22 }
 0x1df   : > { %v1224_v24 = vpack.c.bf16 %v1208_v23, %v1208_v23 }
 0x1e0   : > { %v1080_v25 = vsub.f32 1.5, %v1079_v44  ;;  %v999_v28 = vpop.xlane.xlu2 %998 }
 0x1e1   : > { %v1436_v29 = vpop.eup %1435  ;;  %1241 = vst.msk [vmem:[%s1850_s28 + $0x8] sm:$0xf] %vm1238_vm2, %v1224_v24  ;;  %v1035_v30 = vmax.f32 %v999_v28, 1e-24 }
 0x1e2   : > { %v1081_v32 = vmul.f32 %v1434_v15, %v1080_v25  ;;  %v1087_v33 = vmul.f32 %v1436_v29, %v1034_v16  ;;  %vm1093_vm15 = vweird.f32 %v1436_v29 }
 0x1e3   : > { %1437 = vrsqrt.f32 %v1035_v30  ;;  %vm1094_vm1 = vmor %vm1092_vm0, %vm1093_vm15  ;;  %vm1102_vm4 = vweird.f32 %v1035_v30 }
 0x1e4   : > { %v1085_v34 = vsel %vm1084_vm14, %v1434_v15, %v1081_v32  ;;  %v1088_v35 = vmul.f32 %v1436_v29, %v1087_v33 }
 0x1e5   : > { %v1209_v38 = vmul.f32 %v1085_v34, %v1768_v60 }
 0x1e6   : > { %v1089_v52 = vmul.f32 0.5, %v1088_v35 }
 0x1e7   : > { %v1225_v40 = vpack.c.bf16 %v1209_v38, %v1209_v38 }
 0x1e8   : > { %v1090_v41 = vsub.f32 1.5, %v1089_v52  ;;  %v1002_v42 = vpop.xlane.xlu0 %1001 }
 0x1e9   : > { %v1438_v43 = vpop.eup %1437  ;;  %1242 = vst.msk [vmem:[%s1850_s28 + $0xc] sm:$0xf] %vm1238_vm2, %v1225_v40  ;;  %v1036_v45 = vmax.f32 %v1002_v42, 1e-24 }
 0x1ea   : > { %v1091_v47 = vmul.f32 %v1436_v29, %v1090_v41  ;;  %v1097_v31 = vmul.f32 %v1438_v43, %v1035_v30  ;;  %vm1103_vm3 = vweird.f32 %v1438_v43 }
 0x1eb   : > { %1439 = vrsqrt.f32 %v1036_v45  ;;  %vm1104_vm5 = vmor %vm1102_vm4, %vm1103_vm3  ;;  %vm1112_vm7 = vweird.f32 %v1036_v45 }
 0x1ec   : > { %v1095_v48 = vsel %vm1094_vm1, %v1436_v29, %v1091_v47  ;;  %v1098_v49 = vmul.f32 %v1438_v43, %v1097_v31 }
 0x1ed   : > { %v1210_v50 = vmul.f32 %v1095_v48, %v1774_v4 }
 0x1ee   : > { %v1099_v60 = vmul.f32 0.5, %v1098_v49 }
 0x1ef   : > { %v1226_v51 = vpack.c.bf16 %v1210_v50, %v1210_v50 }
 0x1f0   : > { %v1100_v53 = vsub.f32 1.5, %v1099_v60  ;;  %v1005_v55 = vpop.xlane.xlu1 %1004 }
 0x1f1   : > { %v1440_v56 = vpop.eup %1439  ;;  %1243 = vst.msk [vmem:[%s1850_s28 + $0x10] sm:$0xf] %vm1238_vm2, %v1226_v51  ;;  %v1037_v57 = vmax.f32 %v1005_v55, 1e-24 }
 0x1f2   : > { %v1101_v58 = vmul.f32 %v1438_v43, %v1100_v53  ;;  %v1107_v59 = vmul.f32 %v1440_v56, %v1036_v45  ;;  %vm1113_vm6 = vweird.f32 %v1440_v56 }
 0x1f3   : > { %1441 = vrsqrt.f32 %v1037_v57  ;;  %vm1114_vm8 = vmor %vm1112_vm7, %vm1113_vm6  ;;  %vm1122_vm10 = vweird.f32 %v1037_v57 }
 0x1f4   : > { %v1105_v61 = vsel %vm1104_vm5, %v1438_v43, %v1101_v58  ;;  %v1108_v62 = vmul.f32 %v1440_v56, %v1107_v59 }
 0x1f5   : > { %v1211_v0 = vmul.f32 %v1105_v61, %v1780_v11 }
 0x1f6   : > { %v1109_v4 = vmul.f32 0.5, %v1108_v62 }
 0x1f7   : > { %v1227_v1 = vpack.c.bf16 %v1211_v0, %v1211_v0 }
 0x1f8   : > { %v1110_v2 = vsub.f32 1.5, %v1109_v4  ;;  %v1008_v3 = vpop.xlane.xlu2 %1007 }
 0x1f9   : > { %v1442_v5 = vpop.eup %1441  ;;  %1244 = vst.msk [vmem:[%s1850_s28 + $0x14] sm:$0xf] %vm1238_vm2, %v1227_v1  ;;  %v1038_v36 = vmax.f32 %v1008_v3, 1e-24 }
 0x1fa   : > { %v1111_v6 = vmul.f32 %v1440_v56, %v1110_v2  ;;  %v1117_v7 = vmul.f32 %v1442_v5, %v1037_v57  ;;  %vm1123_vm9 = vweird.f32 %v1442_v5 }
 0x1fb   : > { %1443 = vrsqrt.f32 %v1038_v36  ;;  %vm1124_vm11 = vmor %vm1122_vm10, %vm1123_vm9  ;;  %vm1132_vm13 = vweird.f32 %v1038_v36 }
 0x1fc   : > { %v1115_v9 = vsel %vm1114_vm8, %v1440_v56, %v1111_v6  ;;  %v1118_v10 = vmul.f32 %v1442_v5, %v1117_v7 }
 0x1fd   : > { %v1212_v12 = vmul.f32 %v1115_v9, %v1786_v19 }
 0x1fe   : > { %v1119_v11 = vmul.f32 0.5, %v1118_v10 }
 0x1ff   : > { %v1228_v13 = vpack.c.bf16 %v1212_v12, %v1212_v12 }
 0x200   : > { %v1120_v14 = vsub.f32 1.5, %v1119_v11  ;;  %v1011_v15 = vpop.xlane.xlu0 %1010 }
 0x201   : > { %v1444_v16 = vpop.eup %1443  ;;  %1245 = vst.msk [vmem:[%s1850_s28 + $0x18] sm:$0xf] %vm1238_vm2, %v1228_v13  ;;  %v1039_v18 = vmax.f32 %v1011_v15, 1e-24 }
 0x202   : > { %v1121_v20 = vmul.f32 %v1442_v5, %v1120_v14  ;;  %v1127_v21 = vmul.f32 %v1444_v16, %v1038_v36  ;;  %vm1133_vm12 = vweird.f32 %v1444_v16 }
 0x203   : > { %1445 = vrsqrt.f32 %v1039_v18  ;;  %vm1134_vm14 = vmor %vm1132_vm13, %vm1133_vm12  ;;  %vm1142_vm0 = vweird.f32 %v1039_v18 }
 0x204   : > { %v1125_v22 = vsel %vm1124_vm11, %v1442_v5, %v1121_v20  ;;  %v1128_v23 = vmul.f32 %v1444_v16, %v1127_v21 }
 0x205   : > { %v1213_v44 = vmul.f32 %v1125_v22, %v1792_v27 }
 0x206   : > { %v1129_v19 = vmul.f32 0.5, %v1128_v23 }
 0x207   : > { %v1229_v24 = vpack.c.bf16 %v1213_v44, %v1213_v44 }
 0x208   : > { %v1130_v25 = vsub.f32 1.5, %v1129_v19  ;;  %v1014_v28 = vpop.xlane.xlu1 %1013 }
 0x209   : > { %v1446_v29 = vpop.eup %1445  ;;  %1246 = vst.msk [vmem:[%s1850_s28 + $0x1c] sm:$0xf] %vm1238_vm2, %v1229_v24  ;;  %v1040_v30 = vmax.f32 %v1014_v28, 1e-24 }
 0x20a   : > { %v1131_v32 = vmul.f32 %v1444_v16, %v1130_v25  ;;  %v1137_v33 = vmul.f32 %v1446_v29, %v1039_v18  ;;  %vm1143_vm15 = vweird.f32 %v1446_v29 }
 0x20b   : > { %1447 = vrsqrt.f32 %v1040_v30  ;;  %vm1144_vm1 = vmor %vm1142_vm0, %vm1143_vm15  ;;  %vm1152_vm4 = vweird.f32 %v1040_v30 }
 0x20c   : > { %v1135_v34 = vsel %vm1134_vm14, %v1444_v16, %v1131_v32  ;;  %v1138_v35 = vmul.f32 %v1446_v29, %v1137_v33 }
 0x20d   : > { %v1214_v38 = vmul.f32 %v1135_v34, %v1798_v37 }
 0x20e   : > { %v1139_v27 = vmul.f32 0.5, %v1138_v35 }
 0x20f   : > { %v1230_v52 = vpack.c.bf16 %v1214_v38, %v1214_v38 }
 0x210   : > { %v1140_v40 = vsub.f32 1.5, %v1139_v27  ;;  %v1017_v41 = vpop.xlane.xlu2 %1016 }
 0x211   : > { %v1448_v42 = vpop.eup %1447  ;;  %1247 = vst.msk [vmem:[%s1850_s28 + $0x20] sm:$0xf] %vm1238_vm2, %v1230_v52  ;;  %v1041_v43 = vmax.f32 %v1017_v41, 1e-24 }
 0x212   : > { %v1141_v45 = vmul.f32 %v1446_v29, %v1140_v40  ;;  %v1147_v47 = vmul.f32 %v1448_v42, %v1040_v30  ;;  %vm1153_vm3 = vweird.f32 %v1448_v42 }
 0x213   : > { %1449 = vrsqrt.f32 %v1041_v43  ;;  %vm1154_vm5 = vmor %vm1152_vm4, %vm1153_vm3  ;;  %vm1162_vm7 = vweird.f32 %v1041_v43 }
 0x214   : > { %v1145_v31 = vsel %vm1144_vm1, %v1446_v29, %v1141_v45  ;;  %v1148_v48 = vmul.f32 %v1448_v42, %v1147_v47 }
 0x215   : > { %v1215_v49 = vmul.f32 %v1145_v31, %v1804_v46 }
 0x216   : > { %v1149_v37 = vmul.f32 0.5, %v1148_v48 }
 0x217   : > { %v1231_v50 = vpack.c.bf16 %v1215_v49, %v1215_v49 }
 0x218   : > { %v1150_v60 = vsub.f32 1.5, %v1149_v37  ;;  %v1020_v51 = vpop.xlane.xlu0 %1019 }
 0x219   : > { %v1450_v53 = vpop.eup %1449  ;;  %1248 = vst.msk [vmem:[%s1850_s28 + $0x24] sm:$0xf] %vm1238_vm2, %v1231_v50  ;;  %v1042_v55 = vmax.f32 %v1020_v51, 1e-24 }
 0x21a   : > { %v1151_v56 = vmul.f32 %v1448_v42, %v1150_v60  ;;  %v1157_v57 = vmul.f32 %v1450_v53, %v1041_v43  ;;  %vm1163_vm6 = vweird.f32 %v1450_v53 }
 0x21b   : > { %1451 = vrsqrt.f32 %v1042_v55  ;;  %vm1164_vm8 = vmor %vm1162_vm7, %vm1163_vm6  ;;  %vm1172_vm10 = vweird.f32 %v1042_v55 }
 0x21c   : > { %v1155_v58 = vsel %vm1154_vm5, %v1448_v42, %v1151_v56  ;;  %v1158_v59 = vmul.f32 %v1450_v53, %v1157_v57 }
 0x21d   : > { %v1216_v61 = vmul.f32 %v1155_v58, %v1810_v54 }
 0x21e   : > { %v1159_v46 = vmul.f32 0.5, %v1158_v59 }
 0x21f   : > { %v1232_v62 = vpack.c.bf16 %v1216_v61, %v1216_v61 }
 0x220   : > { %v1160_v0 = vsub.f32 1.5, %v1159_v46  ;;  %v1023_v4 = vpop.xlane.xlu1 %1022 }
 0x221   : > { %v1452_v1 = vpop.eup %1451  ;;  %1249 = vst.msk [vmem:[%s1850_s28 + $0x28] sm:$0xf] %vm1238_vm2, %v1232_v62  ;;  %v1043_v2 = vmax.f32 %v1023_v4, 1e-24 }
 0x222   : > { %v1161_v3 = vmul.f32 %v1450_v53, %v1160_v0  ;;  %v1167_v5 = vmul.f32 %v1452_v1, %v1042_v55  ;;  %vm1173_vm9 = vweird.f32 %v1452_v1 }
 0x223   : > { %1453 = vrsqrt.f32 %v1043_v2  ;;  %vm1174_vm11 = vmor %vm1172_vm10, %vm1173_vm9  ;;  %vm1182_vm13 = vweird.f32 %v1043_v2 }
 0x224   : > { %v1165_v36 = vsel %vm1164_vm8, %v1450_v53, %v1161_v3  ;;  %v1168_v6 = vmul.f32 %v1452_v1, %v1167_v5 }
 0x225   : > { %v1217_v7 = vmul.f32 %v1165_v36, %v1816_v63 }
 0x226   : > { %v1169_v54 = vmul.f32 0.5, %v1168_v6 }
 0x227   : > { %v1233_v9 = vpack.c.bf16 %v1217_v7, %v1217_v7 }
 0x228   : > { %v1170_v10 = vsub.f32 1.5, %v1169_v54  ;;  %v1026_v12 = vpop.xlane.xlu2 %1025 }
 0x229   : > { %v1454_v11 = vpop.eup %1453  ;;  %1250 = vst.msk [vmem:[%s1850_s28 + $0x2c] sm:$0xf] %vm1238_vm2, %v1233_v9  ;;  %v1044_v13 = vmax.f32 %v1026_v12, 1e-24 }
 0x22a   : > { %v1171_v14 = vmul.f32 %v1452_v1, %v1170_v10  ;;  %v1177_v15 = vmul.f32 %v1454_v11, %v1043_v2  ;;  %vm1183_vm12 = vweird.f32 %v1454_v11 }
 0x22b   : > { %1455 = vrsqrt.f32 %v1044_v13  ;;  %vm1184_vm14 = vmor %vm1182_vm13, %vm1183_vm12  ;;  %vm1192_vm0 = vweird.f32 %v1044_v13 }
 0x22c   : > { %v1175_v16 = vsel %vm1174_vm11, %v1452_v1, %v1171_v14  ;;  %v1178_v18 = vmul.f32 %v1454_v11, %v1177_v15 }
 0x22d   : > { %v1218_v20 = vmul.f32 %v1175_v16, %v1822_v8 }
 0x22e   : > { %v1179_v63 = vmul.f32 0.5, %v1178_v18 }
 0x22f   : > { %v1234_v21 = vpack.c.bf16 %v1218_v20, %v1218_v20 }
 0x230   : > { %v1180_v22 = vsub.f32 1.5, %v1179_v63  ;;  %v1029_v23 = vpop.xlane.xlu0 %1028 }
 0x231   : > { %v1456_v44 = vpop.eup %1455  ;;  %1251 = vst.msk [vmem:[%s1850_s28 + $0x30] sm:$0xf] %vm1238_vm2, %v1234_v21  ;;  %v1045_v19 = vmax.f32 %v1029_v23, 1e-24 }
 0x232   : > { %v1181_v24 = vmul.f32 %v1454_v11, %v1180_v22  ;;  %v1187_v25 = vmul.f32 %v1456_v44, %v1044_v13  ;;  %vm1193_vm15 = vweird.f32 %v1456_v44 }
 0x233   : > { %1457 = vrsqrt.f32 %v1045_v19  ;;  %vm1194_vm1 = vmor %vm1192_vm0, %vm1193_vm15  ;;  %vm1202_vm4 = vweird.f32 %v1045_v19 }
 0x234   : > { %v1185_v28 = vsel %vm1184_vm14, %v1454_v11, %v1181_v24  ;;  %v1188_v29 = vmul.f32 %v1456_v44, %v1187_v25 }
 0x235   : > { %v1219_v30 = vmul.f32 %v1185_v28, %v1828_v17 }
 0x236   : > { %v1189_v8 = vmul.f32 0.5, %v1188_v29 }
 0x237   : > { %v1235_v32 = vpack.c.bf16 %v1219_v30, %v1219_v30 }
 0x238   : > { %v1190_v33 = vsub.f32 1.5, %v1189_v8 }
 0x239   : > { %v1458_v34 = vpop.eup %1457  ;;  %1252 = vst.msk [vmem:[%s1850_s28 + $0x34] sm:$0xf] %vm1238_vm2, %v1235_v32 }
 0x23a   : > { %v1191_v35 = vmul.f32 %v1456_v44, %v1190_v33  ;;  %v1197_v38 = vmul.f32 %v1458_v34, %v1045_v19  ;;  %vm1203_vm3 = vweird.f32 %v1458_v34 }
 0x23b   : > { %vm1204_vm5 = vmor %vm1202_vm4, %vm1203_vm3 }
 0x23c   : > { %v1195_v27 = vsel %vm1194_vm1, %v1456_v44, %v1191_v35  ;;  %v1198_v52 = vmul.f32 %v1458_v34, %v1197_v38 }
 0x23d   : > { %v1220_v40 = vmul.f32 %v1195_v27, %v1834_v26 }
 0x23e   : > { %v1199_v41 = vmul.f32 0.5, %v1198_v52 }
 0x23f   : > { %v1236_v42 = vpack.c.bf16 %v1220_v40, %v1220_v40 }
 0x240   : > { %v1200_v17 = vsub.f32 1.5, %v1199_v41 }
 0x241   : > { %1253 = vst.msk [vmem:[%s1850_s28 + $0x38] sm:$0xf] %vm1238_vm2, %v1236_v42 }
 0x242   : > { %v1201_v43 = vmul.f32 %v1458_v34, %v1200_v17 }
 0x244   : > { %v1205_v45 = vsel %vm1204_vm5, %v1458_v34, %v1201_v43 }
 0x245   : > { %v1221_v47 = vmul.f32 %v1205_v45, %v1840_v39 }
 0x247   : > { %v1237_v31 = vpack.c.bf16 %v1221_v47, %v1221_v47 }
 0x249   : > { %1254 = vst.msk [vmem:[%s1850_s28 + $0x3c] sm:$0xf] %vm1238_vm2, %v1237_v31 }
 0x24a PF: > { %s16_s23 = sadd.s32 1, %s1481_s23   ;;  %s1915_s21 = smov %s1477_s22 }
 0x24b   : > { %p13_p6 = scmp.ge.s32.totalorder %s16_s23, 4   ;;  %s1916_s22 = smov %s1918_s24 }
 0x24d   :  { %15 = sbr.rel (!%p13_p6) target bundleno = 2 (0x2), region = 88 }

</bundles_post_ra>
